<compile_context>
chip_gen: v6e
topology: v6e:2x2x1
jax: 0.10.0
libtpu: 0.0.40
codegen_flags: <defaults>
</compile_context>

<pallas_src>
import jax
import jax.numpy as jnp
from jax.experimental import pallas as pl
from jax.experimental.pallas import tpu as pltpu


def _affine_relu_kernel(w_ref, b_ref, x_ref, o_ref):
    # w_ref, b_ref: (1,) float32 scalars in SMEM (scalar path, no per-step DMA).
    # x_ref: (block_rows, lane) tile in its ORIGINAL dtype; o_ref: f32 tile.
    w = w_ref[0]
    b = b_ref[0]
    x = x_ref[...].astype(jnp.float32)          # cast fused into the kernel
    o_ref[...] = jnp.maximum(x * w + b, 0.0)


# Below this many elements (~256 KiB f32) a single full-array block is used:
# per-step pipeline overhead dominates and megacore sharding buys nothing.
_SINGLE_BLOCK_ELEMS = 64 * 1024
_LANES = (1024, 512, 256, 128)


def _run_2d(x2d, w_arr, b_arr, *, max_block_rows=1024):
    """Run relu(x*w+b) on a lane-dense (rows, lane) view."""
    rows, lane = x2d.shape

    if rows * lane <= _SINGLE_BLOCK_ELEMS:
        # Single full-array block (block shape == array shape): one grid step,
        # no (8,128) divisibility requirement, zero pipeline overhead.
        block_rows = rows
        grid_rows = 1
    else:
        # At least two blocks so the "parallel" grid axis can shard across
        # TensorCores on multi-TC chips; blocks up to 4 MiB (1024 x 1024 f32).
        half_rows = -(-((rows + 1) // 2) // 8) * 8      # ~rows/2, multiple of 8
        block_rows = max(8, min(max_block_rows, half_rows))
        grid_rows = pl.cdiv(rows, block_rows)           # partial edge block OK

    return pl.pallas_call(
        _affine_relu_kernel,
        out_shape=jax.ShapeDtypeStruct((rows, lane), jnp.float32),
        grid_spec=pltpu.PrefetchScalarGridSpec(
            num_scalar_prefetch=0,
            grid=(grid_rows,),
            in_specs=[
                # Scalars stay on the scalar path (SMEM).
                pl.BlockSpec(memory_space=pltpu.MemorySpace.SMEM),
                pl.BlockSpec(memory_space=pltpu.MemorySpace.SMEM),
                pl.BlockSpec((block_rows, lane), lambda i: (i, 0)),
            ],
            out_specs=pl.BlockSpec((block_rows, lane), lambda i: (i, 0)),
        ),
        compiler_params=pltpu.CompilerParams(
            dimension_semantics=("parallel",),
            # 4 MiB blocks * 2 arrays * double buffering = 16 MiB; raise the
            # scoped limit explicitly (v5e default is only 16 MiB).
            vmem_limit_bytes=32 * 1024 * 1024,
        ),
    )(w_arr, b_arr, x2d)


def conv1x1_relu(x_nchw, weight, bias):
    """Forward of M: relu(conv1x1(x)) for x: [N, 1, H, W].

    weight: [1,1,1,1] (any single-element array), bias: [1]. Quant stubs are
    identity in the float forward.
    """
    orig_shape = x_nchw.shape
    N, C, H, W = orig_shape
    assert C == 1, "Conv2d(1, 1, 1) expects a single input channel"

    total = N * C * H * W
    w_arr = jnp.asarray(weight).reshape(1).astype(jnp.float32)
    b_arr = jnp.asarray(bias).reshape(1).astype(jnp.float32)

    if total == 0:
        return jnp.zeros(orig_shape, jnp.float32)

    flat = x_nchw.reshape(-1)        # zero-copy; dtype cast happens in-kernel

    lane = next((l for l in _LANES if total % l == 0), None)
    if lane is not None:
        # Whole tensor is a zero-copy lane-dense view: no pad, no final slice.
        out2d = _run_2d(flat.reshape(total // lane, lane), w_arr, b_arr)
        return out2d.reshape(orig_shape)

    # Ragged total: lane-divisible prefix through the kernel, tiny (< lane)
    # tail via a trivial jnp expression. No whole-array pad / slice.
    lane = 1024 if total >= 1024 else 128
    prefix = (total // lane) * lane
    w = w_arr[0]
    b = b_arr[0]
    pieces = []
    if prefix:
        head = _run_2d(flat[:prefix].reshape(prefix // lane, lane), w_arr, b_arr)
        pieces.append(head.reshape(-1))
    tail = flat[prefix:]
    pieces.append(jnp.maximum(tail.astype(jnp.float32) * w + b, 0.0))
    out = pieces[0] if len(pieces) == 1 else jnp.concatenate(pieces)
    return out.reshape(orig_shape)


if __name__ == "__main__":
    key = jax.random.PRNGKey(0)
    kx, kw, kb, kx2, kx3 = jax.random.split(key, 5)

    # Deterministic parameters (Conv2d(1,1,1) -> weight [1,1,1,1], bias [1]).
    weight = jax.random.normal(kw, (1, 1, 1, 1), dtype=jnp.float32) * 0.5
    bias = jax.random.normal(kb, (1,), dtype=jnp.float32) * 0.1
    w_s = weight[0, 0, 0, 0]
    b_s = bias[0]

    # Small shape consistent with Conv2d(1, 1, 1): N=2, C=1, H=W=16 (lane path).
    x = jax.random.normal(kx, (2, 1, 16, 16), dtype=jnp.float32)
    y = conv1x1_relu(x, weight, bias)
    jax.block_until_ready(y)
    y_ref = jnp.maximum(x * w_s + b_s, 0.0)
    assert jnp.allclose(y, y_ref, atol=1e-6), "mismatch vs reference (small)"

    # Ragged element count (1581) -> prefix kernel + jnp tail path.
    x2 = jax.random.normal(kx2, (3, 1, 17, 31), dtype=jnp.float32)
    y2 = conv1x1_relu(x2, weight, bias)
    jax.block_until_ready(y2)
    y2_ref = jnp.maximum(x2 * w_s + b_s, 0.0)
    assert jnp.allclose(y2, y2_ref, atol=1e-6), "mismatch vs reference (ragged)"

    # Multi-block path with a partial (masked) edge block: rows=69, grid=2.
    x3 = jax.random.normal(kx3, (1, 1, 69, 1024), dtype=jnp.float32)
    y3 = conv1x1_relu(x3, weight, bias)
    jax.block_until_ready(y3)
    y3_ref = jnp.maximum(x3 * w_s + b_s, 0.0)
    assert jnp.allclose(y3, y3_ref, atol=1e-6), "mismatch vs reference (edge block)"

    print("KERNEL_OK")
</pallas_src>

<mosaic_0001>
module attributes {stable_mosaic.version = 11 : i64} {
  func.func @_affine_relu_kernel(%arg0: i32, %arg1: memref<1xf32, #tpu.memory_space<smem>>, %arg2: memref<1xf32, #tpu.memory_space<smem>>, %arg3: memref<1x512xf32, #tpu.memory_space<vmem>>, %arg4: memref<1x512xf32, #tpu.memory_space<vmem>>) attributes {dimension_semantics = [#tpu.dimension_semantics<parallel>], iteration_bounds = array<i64: 1>, scalar_prefetch = 0 : i64, scratch_operands = 0 : i64, tpu.core_type = #tpu.core_type<tc>, window_params = [{transform_indices = @transform_0, window_bounds = array<i64: 1>}, {transform_indices = @transform_1, window_bounds = array<i64: 1>}, {transform_indices = @transform_2, window_bounds = array<i64: 1, 512>}, {transform_indices = @transform_3, window_bounds = array<i64: 1, 512>}]} {
    %c0 = arith.constant 0 : index
    %0 = memref.load %arg1[%c0] : memref<1xf32, #tpu.memory_space<smem>>
    %c0_0 = arith.constant 0 : index
    %1 = memref.load %arg2[%c0_0] : memref<1xf32, #tpu.memory_space<smem>>
    %c0_1 = arith.constant 0 : index
    %c0_2 = arith.constant 0 : index
    %2 = vector.load %arg3[%c0_1, %c0_2] : memref<1x512xf32, #tpu.memory_space<vmem>>, vector<1x512xf32>
    %3 = vector.broadcast %0 : f32 to vector<1x512xf32>
    %4 = arith.mulf %2, %3 : vector<1x512xf32>
    %5 = vector.broadcast %1 : f32 to vector<1x512xf32>
    %6 = arith.addf %4, %5 : vector<1x512xf32>
    %cst = arith.constant 0.000000e+00 : f32
    %7 = vector.broadcast %cst : f32 to vector<1x512xf32>
    %8 = arith.maximumf %6, %7 : vector<1x512xf32>
    %c0_3 = arith.constant 0 : index
    %c0_4 = arith.constant 0 : index
    %9 = vector.load %arg4[%c0_3, %c0_4] : memref<1x512xf32, #tpu.memory_space<vmem>>, vector<1x512xf32>
    tpu.vector_store %arg4[%c0_3, %c0_4], %8 {strides = array<i32>} : memref<1x512xf32, #tpu.memory_space<vmem>>, vector<1x512xf32>,
    return
  }
  func.func @transform_0(%arg0: i32) -> i32 {
    %c0_i32 = arith.constant 0 : i32
    %c0_i32_0 = arith.constant 0 : i32
    return %c0_i32 : i32
  }
  func.func @transform_1(%arg0: i32) -> i32 {
    %c0_i32 = arith.constant 0 : i32
    %c0_i32_0 = arith.constant 0 : i32
    return %c0_i32 : i32
  }
  func.func @transform_2(%arg0: i32) -> (i32, i32) {
    %c0_i32 = arith.constant 0 : i32
    %c0_i32_0 = arith.constant 0 : i32
    return %arg0, %c0_i32 : i32, i32
  }
  func.func @transform_3(%arg0: i32) -> (i32, i32) {
    %c0_i32 = arith.constant 0 : i32
    %c0_i32_0 = arith.constant 0 : i32
    return %arg0, %c0_i32 : i32, i32
  }
}

</mosaic_0001>

<bundles_post_ra>
// kernel: tpu_custom_call.1
= control target key start
LH: loop header
LB: loop body
LE: loop exit
PB: predicated region body
PF: predicated region fallthrough
CT: control target
= control target key end

     0   :  { %v25_v3 = vlaneseq  ;;  %s100_s0 = inlined_call_operand.<no memory space> [shape: f32[1], index: 0, kind: input, shape index: {}]   ;;  %s101_s1 = inlined_call_operand.<no memory space> [shape: f32[1], index: 1, kind: input, shape index: {}]   ;;  %s102_s2 = inlined_call_operand.vmem [shape: f32[1,512], index: 2, kind: input, shape index: {}]   ;;  %s103_s3 = inlined_call_operand.hbm [shape: f32[1,512], index: 3, kind: output, shape index: {}]  }
   0x1   :  { %v19_v0 = vld [vmem:[%s102_s2] sm:$0xf]  ;;  %v20_v1 = vstv %s100_s0  ;;  %v22_v2 = vstv %s101_s1 }
   0x2   :  { %10 = vsyncpa [#allocation5], 0  ;;  %v21_v4 = vmul.f32 %v20_v1, %v19_v0  ;;  %s67_s18 = smov [#allocation4]   ;;  %vm27_vm0 = vcmp.lt.s32.totalorder %v25_v3, 512 }
   0x3   :  { %s36_s19 = sshll.u32 %s67_s18, 4  ;;  %s37_s19 = int_to_ptr.vmem [resolvable:$true] %s36_s19 }
   0x4   :  { %v23_v5 = vadd.f32 %v22_v2, %v21_v4  ;;  %s45_s20 = scalar_lea.vmem %s37_s19, 64  ;;  %p50_p1 = scmp.lt.s32.totalorder %s37_s19, %s37_s19 }
   0x5   :  { %p46_p0 = scmp.ne.s32.totalorder %s37_s19, %s45_s20  ;;  %p51_p2 = scmp.lt.s32.totalorder %s45_s20, %s45_s20 }
   0x6   :  { %v24_v6 = vmax.f32 %v23_v5, 0.0 }
   0x7   :  { %p52_p3 = por %p51_p2, %p50_p1 }
   0x8   :  { %29 = vst.msk [vmem:[#allocation4] sm:$0xf] %vm27_vm0, %v24_v6 }
   0x9   :  { %p53_p4 = pnand %p52_p3, %p46_p0 }
   0xb   :  { %56 = shalt.err (!%p53_p4)
}
   0xc   :  { %39 = dma.vmem_to_hbm [thread:$0]  %s37_s19, 64, %s103_s3, [#allocation5]  }
   0xd   :  { %65 = dma.done.wait [#allocation5], 64  }
   0xe   :  { %66 = vsyncadd [#allocation5], 4294967232 }
   0xf   :  { %43 = vsyncpa [#allocation5], 1 }

</bundles_post_ra>
